<compile_context>
chip_gen: v7x
topology: tpu7x:2x2x1
jax: 0.10.0
libtpu: 0.0.40
codegen_flags: <defaults>
</compile_context>

<pallas_src>
import functools

import jax
import jax.numpy as jnp
from jax import lax
from jax.experimental import pallas as pl
from jax.experimental.pallas import tpu as pltpu


def _predmil_kernel(bag_ref, valid_ref, x_ref, w1_ref, b1_ref, w2_ref, b2_ref,
                    logits_sum_ref, probs_sum_ref, *, use_softmax):
    t = pl.program_id(0)

    # The (B, C) accumulators are resident across the whole grid (constant out index_map).
    @pl.when(t == 0)
    def _init():
        logits_sum_ref[...] = jnp.zeros_like(logits_sum_ref)
        probs_sum_ref[...] = jnp.zeros_like(probs_sum_ref)

    # Layer 1: Linear(D_in, H) + ReLU (MXU matmul, f32 accumulate).
    h = jnp.dot(x_ref[...], w1_ref[...], preferred_element_type=jnp.float32)
    h = jnp.maximum(h + b1_ref[...], 0.0)

    # Layer 2: Linear(H, C).
    logits = jnp.dot(h, w2_ref[...], preferred_element_type=jnp.float32) + b2_ref[...]

    if use_softmax:
        m = jnp.max(logits, axis=1, keepdims=True)
        e = jnp.exp(logits - m)
        # EUP reciprocal instead of a VALU divide sequence.
        probs = e * pl.reciprocal(jnp.sum(e, axis=1, keepdims=True), approx=True)
    else:
        probs = 1.0 / (1.0 + jnp.exp(-logits))          # sigmoid (n_classes == 1)

    # Mask the zero-padded rows of a partial tile before reducing.
    n_valid = valid_ref[t]
    row = lax.broadcasted_iota(jnp.int32, logits.shape, 0)
    keep = row < n_valid
    logits_part = jnp.sum(jnp.where(keep, logits, 0.0), axis=0, keepdims=True)  # (1, C)
    probs_part = jnp.sum(jnp.where(keep, probs, 0.0), axis=0, keepdims=True)    # (1, C)

    # Accumulate into this tile's bag row of the resident (B, C) sums.
    b = bag_ref[t]
    logits_sum_ref[pl.ds(b, 1), :] += logits_part
    probs_sum_ref[pl.ds(b, 1), :] += probs_part


def predmil_forward(x_list, params, n_classes=1, aggregate="mean", agg_level="preds",
                    top_k=0, return_features=False, tile_n=1024,
                    input_dtype=jnp.float32):
    """Mirrors PredMIL.forward (default config: top_k=0, aggregate='mean')."""
    if top_k != 0:
        # TODO(synk): top_k instance selection (topk over dim=0 + index_select) not implemented.
        raise NotImplementedError("top_k != 0 is not supported by this kernel")
    if aggregate != "mean":
        # TODO(synk): 'max' / 'min' / float-quantile (kthvalue) aggregation not implemented.
        raise NotImplementedError(f"aggregate={aggregate!r} is not supported by this kernel")
    del agg_level  # only used in torch when top_k != 0

    w1, b1, w2, b2 = params
    d_in, hdim = w1.shape
    c = w2.shape[1]
    n_bags = len(x_list)

    # Build the flat tile schedule: pad each bag to a multiple of tile_n rows and
    # concatenate; record (bag id, #valid rows) per tile for scalar prefetch.
    bag_ids, valid_rows, x_chunks, counts = [], [], [], []
    for bag_idx, x in enumerate(x_list):
        n = x.shape[0]
        counts.append(n)
        n_tiles = -(-n // tile_n)
        pad = n_tiles * tile_n - n
        x_chunks.append(jnp.pad(x, ((0, pad), (0, 0))))
        for ti in range(n_tiles):
            bag_ids.append(bag_idx)
            valid_rows.append(min(tile_n, n - ti * tile_n))

    x_all = jnp.concatenate(x_chunks, axis=0).astype(input_dtype)
    w1c = w1.astype(input_dtype)  # optionally bf16 to halve the dominant HBM stream
    n_tiles_total = len(bag_ids)
    bag_ids = jnp.asarray(bag_ids, dtype=jnp.int32)
    valid_rows = jnp.asarray(valid_rows, dtype=jnp.int32)

    kernel = functools.partial(_predmil_kernel, use_softmax=(n_classes > 1))

    grid_spec = pltpu.PrefetchScalarGridSpec(
        num_scalar_prefetch=2,                 # bag_ids, valid_rows -> SMEM
        grid=(n_tiles_total,),
        in_specs=[
            pl.BlockSpec((tile_n, d_in), lambda t, bag, valid: (t, 0)),   # x tile
            pl.BlockSpec((d_in, hdim), lambda t, bag, valid: (0, 0)),     # W1 (resident)
            pl.BlockSpec((1, hdim), lambda t, bag, valid: (0, 0)),        # b1 (resident)
            pl.BlockSpec((hdim, c), lambda t, bag, valid: (0, 0)),        # W2 (resident)
            pl.BlockSpec((1, c), lambda t, bag, valid: (0, 0)),           # b2 (resident)
        ],
        out_specs=(
            pl.BlockSpec((n_bags, c), lambda t, bag, valid: (0, 0)),      # sum(logits) per bag
            pl.BlockSpec((n_bags, c), lambda t, bag, valid: (0, 0)),      # sum(probs)  per bag
        ),
    )

    logits_sum, probs_sum = pl.pallas_call(
        kernel,
        out_shape=(jax.ShapeDtypeStruct((n_bags, c), jnp.float32),
                   jax.ShapeDtypeStruct((n_bags, c), jnp.float32)),
        grid_spec=grid_spec,
        compiler_params=pltpu.CompilerParams(
            # The single flat tile axis carries the (B, C) accumulators -> sequential.
            dimension_semantics=("arbitrary",),
        ),
    )(bag_ids, valid_rows, x_all, w1c, b1, w2, b2)

    inv_counts = (1.0 / jnp.asarray(counts, dtype=jnp.float32)).reshape(n_bags, 1)
    logits = logits_sum * inv_counts          # per-bag mean over instances
    probs = probs_sum * inv_counts

    if return_features:
        # top_k == 0  ->  features are just the raw input bags (torch returns h itself).
        # TODO(synk): like torch.stack in the reference, this requires equal bag sizes.
        features = jnp.stack(x_list, axis=0)
        return logits, probs, dict(features=features)
    return logits, probs


def init_params(key, d_in, hdim, n_classes):
    """xavier_normal_ weights / zero biases (initialize_weights), stored as (in, out)."""
    k1, k2 = jax.random.split(key)
    std1 = (2.0 / (d_in + hdim)) ** 0.5
    w1 = std1 * jax.random.normal(k1, (d_in, hdim), dtype=jnp.float32)
    b1 = jnp.zeros((1, hdim), dtype=jnp.float32)
    std2 = (2.0 / (hdim + n_classes)) ** 0.5
    w2 = std2 * jax.random.normal(k2, (hdim, n_classes), dtype=jnp.float32)
    b2 = jnp.zeros((1, n_classes), dtype=jnp.float32)
    return w1, b1, w2, b2


def _reference_forward(x_list, params, n_classes):
    """Plain-JAX reference of PredMIL.forward (top_k=0, aggregate='mean')."""
    w1, b1, w2, b2 = params
    ls, ps = [], []
    for x in x_list:
        h = jnp.maximum(x @ w1 + b1, 0.0)
        logits = h @ w2 + b2
        probs = (jax.nn.softmax(logits, axis=1) if n_classes > 1
                 else jax.nn.sigmoid(logits))
        ls.append(jnp.mean(logits, axis=0))
        ps.append(jnp.mean(probs, axis=0))
    return jnp.vstack(ls), jnp.vstack(ps)


if __name__ == "__main__":
    key = jax.random.PRNGKey(0)
    D_IN, HID = 128, 128          # scaled-down size=[128, 128] (default is [1024, 512])
    TILE_N = 64                   # small tile for the tiny demo bags (default 1024 for prod)

    # Three bags with different instance counts (exercises multi-tile bags + partial tiles).
    bag_sizes = [150, 40, 13]
    keys = jax.random.split(jax.random.fold_in(key, 1), len(bag_sizes))
    x_list = [jax.random.normal(k, (n, D_IN), dtype=jnp.float32)
              for k, n in zip(keys, bag_sizes)]

    # --- Config A: PredMIL defaults (n_classes=1 -> sigmoid probs, aggregate='mean') ---
    params1 = init_params(jax.random.fold_in(key, 2), D_IN, HID, 1)
    logits1, probs1 = predmil_forward(x_list, params1, n_classes=1, tile_n=TILE_N)
    jax.block_until_ready((logits1, probs1))

    logits1_r, probs1_r = _reference_forward(x_list, params1, 1)
    assert logits1.shape == (len(x_list), 1) and probs1.shape == (len(x_list), 1)
    assert jnp.allclose(logits1, logits1_r, atol=5e-3, rtol=5e-3)
    assert jnp.allclose(probs1, probs1_r, atol=5e-3, rtol=5e-3)

    # --- Config B: n_classes=4 -> softmax probs; also exercise return_features ---
    params4 = init_params(jax.random.fold_in(key, 3), D_IN, HID, 4)
    xb_list = [x_list[0], x_list[0]]              # equal bag sizes (torch.stack requirement)
    logits4, probs4, rd = predmil_forward(xb_list, params4, n_classes=4,
                                          tile_n=TILE_N, return_features=True)
    jax.block_until_ready((logits4, probs4, rd["features"]))

    logits4_r, probs4_r = _reference_forward(xb_list, params4, 4)
    assert logits4.shape == (2, 4) and probs4.shape == (2, 4)
    assert jnp.allclose(logits4, logits4_r, atol=5e-3, rtol=5e-3)
    assert jnp.allclose(probs4, probs4_r, atol=5e-3, rtol=5e-3)
    assert rd["features"].shape == (2, bag_sizes[0], D_IN)
    assert jnp.allclose(rd["features"], jnp.stack(xb_list, axis=0))

    print("KERNEL_OK")
</pallas_src>

<mosaic_0001>
module attributes {stable_mosaic.version = 11 : i64} {
  func.func @_predmil_kernel(%arg0: i32, %arg1: memref<5xi32, #tpu.memory_space<smem>>, %arg2: memref<5xi32, #tpu.memory_space<smem>>, %arg3: memref<64x128xf32, #tpu.memory_space<vmem>>, %arg4: memref<128x128xf32, #tpu.memory_space<vmem>>, %arg5: memref<1x128xf32, #tpu.memory_space<vmem>>, %arg6: memref<128x1xf32, #tpu.memory_space<vmem>>, %arg7: memref<1x1xf32, #tpu.memory_space<vmem>>, %arg8: memref<3x1xf32, #tpu.memory_space<vmem>>, %arg9: memref<3x1xf32, #tpu.memory_space<vmem>>) attributes {dimension_semantics = [#tpu.dimension_semantics<arbitrary>], iteration_bounds = array<i64: 5>, scalar_prefetch = 2 : i64, scratch_operands = 0 : i64, tpu.core_type = #tpu.core_type<tc>, window_params = [{transform_indices = @transform_0, window_bounds = array<i64: 64, 128>}, {pipeline_mode = #tpu.pipeline_mode<synchronous>, transform_indices = @transform_1, window_bounds = array<i64: 128, 128>}, {pipeline_mode = #tpu.pipeline_mode<synchronous>, transform_indices = @transform_2, window_bounds = array<i64: 1, 128>}, {pipeline_mode = #tpu.pipeline_mode<synchronous>, transform_indices = @transform_3, window_bounds = array<i64: 128, 1>}, {pipeline_mode = #tpu.pipeline_mode<synchronous>, transform_indices = @transform_4, window_bounds = array<i64: 1, 1>}, {pipeline_mode = #tpu.pipeline_mode<synchronous>, transform_indices = @transform_5, window_bounds = array<i64: 3, 1>}, {pipeline_mode = #tpu.pipeline_mode<synchronous>, transform_indices = @transform_6, window_bounds = array<i64: 3, 1>}]} {
    %c0_i32 = arith.constant 0 : i32
    %0 = arith.cmpi eq, %arg0, %c0_i32 : i32
    %1 = arith.extui %0 : i1 to i32
    %c0_i32_0 = arith.constant 0 : i32
    %2 = arith.cmpi ne, %1, %c0_i32_0 : i32
    scf.if %2 {
      %cst_23 = arith.constant 0.000000e+00 : f32
      %48 = vector.broadcast %cst_23 : f32 to vector<3x1xf32>
      %c0_24 = arith.constant 0 : index
      %c0_25 = arith.constant 0 : index
      %49 = vector.load %arg8[%c0_24, %c0_25] : memref<3x1xf32, #tpu.memory_space<vmem>>, vector<3x1xf32>
      tpu.vector_store %arg8[%c0_24, %c0_25], %48 {strides = array<i32>} : memref<3x1xf32, #tpu.memory_space<vmem>>, vector<3x1xf32>,
      %cst_26 = arith.constant 0.000000e+00 : f32
      %50 = vector.broadcast %cst_26 : f32 to vector<3x1xf32>
      %c0_27 = arith.constant 0 : index
      %c0_28 = arith.constant 0 : index
      %51 = vector.load %arg9[%c0_27, %c0_28] : memref<3x1xf32, #tpu.memory_space<vmem>>, vector<3x1xf32>
      tpu.vector_store %arg9[%c0_27, %c0_28], %50 {strides = array<i32>} : memref<3x1xf32, #tpu.memory_space<vmem>>, vector<3x1xf32>,
    } else {
    }
    %c0 = arith.constant 0 : index
    %c0_1 = arith.constant 0 : index
    %3 = vector.load %arg3[%c0, %c0_1] : memref<64x128xf32, #tpu.memory_space<vmem>>, vector<64x128xf32>
    %c0_2 = arith.constant 0 : index
    %c0_3 = arith.constant 0 : index
    %4 = vector.load %arg4[%c0_2, %c0_3] : memref<128x128xf32, #tpu.memory_space<vmem>>, vector<128x128xf32>
    %cst = arith.constant dense<0.000000e+00> : vector<64x128xf32>
    %5 = tpu.matmul %3, %4, %cst {dimension_numbers = #tpu.dot_dimension_numbers<[1], [0], [0], [1], [0, 0, 1, 1], [], []>} : vector<64x128xf32>, vector<128x128xf32>, vector<64x128xf32> -> vector<64x128xf32>
    %c0_4 = arith.constant 0 : index
    %c0_5 = arith.constant 0 : index
    %6 = vector.load %arg5[%c0_4, %c0_5] : memref<1x128xf32, #tpu.memory_space<vmem>>, vector<1x128xf32>
    %7 = vector.broadcast %6 : vector<1x128xf32> to vector<64x128xf32>
    %8 = arith.addf %5, %7 : vector<64x128xf32>
    %cst_6 = arith.constant 0.000000e+00 : f32
    %9 = vector.broadcast %cst_6 : f32 to vector<64x128xf32>
    %10 = arith.maximumf %8, %9 : vector<64x128xf32>
    %c0_7 = arith.constant 0 : index
    %c0_8 = arith.constant 0 : index
    %11 = vector.load %arg6[%c0_7, %c0_8] : memref<128x1xf32, #tpu.memory_space<vmem>>, vector<128x1xf32>
    %cst_9 = arith.constant dense<0.000000e+00> : vector<64x1xf32>
    %12 = tpu.matmul %10, %11, %cst_9 {dimension_numbers = #tpu.dot_dimension_numbers<[1], [0], [0], [1], [0, 0, 1, 1], [], []>} : vector<64x128xf32>, vector<128x1xf32>, vector<64x1xf32> -> vector<64x1xf32>
    %c0_10 = arith.constant 0 : index
    %c0_11 = arith.constant 0 : index
    %13 = vector.load %arg7[%c0_10, %c0_11] : memref<1x1xf32, #tpu.memory_space<vmem>>, vector<1x1xf32>
    %14 = vector.broadcast %13 : vector<1x1xf32> to vector<64x1xf32>
    %15 = arith.addf %12, %14 : vector<64x1xf32>
    %cst_12 = arith.constant 0.000000e+00 : f32
    %16 = vector.broadcast %cst_12 : f32 to vector<64x1xf32>
    %17 = arith.subf %16, %15 : vector<64x1xf32>
    %18 = math.exp %17 : vector<64x1xf32>
    %cst_13 = arith.constant 1.000000e+00 : f32
    %19 = vector.broadcast %cst_13 : f32 to vector<64x1xf32>
    %20 = arith.addf %19, %18 : vector<64x1xf32>
    %cst_14 = arith.constant 1.000000e+00 : f32
    %21 = vector.broadcast %cst_14 : f32 to vector<64x1xf32>
    %22 = arith.divf %21, %20 : vector<64x1xf32>
    %23 = arith.index_cast %arg0 : i32 to index
    %24 = memref.load %arg2[%23] : memref<5xi32, #tpu.memory_space<smem>>
    %25 = tpu.iota {dimensions = array<i32: 0>} : vector<64x1xi32>
    %26 = vector.broadcast %24 : i32 to vector<64x1xi32>
    %27 = arith.cmpi slt, %25, %26 : vector<64x1xi32>
    %cst_15 = arith.constant 0.000000e+00 : f32
    %28 = vector.broadcast %cst_15 : f32 to vector<64x1xf32>
    %29 = arith.select %27, %15, %28 : vector<64x1xi1>, vector<64x1xf32>
    %cst_16 = arith.constant dense<0.000000e+00> : vector<1xf32>
    %30 = vector.multi_reduction <add>, %29, %cst_16 [0] : vector<64x1xf32> to vector<1xf32>
    %31 = vector.shape_cast %30 : vector<1xf32> to vector<1x1xf32>
    %cst_17 = arith.constant 0.000000e+00 : f32
    %32 = vector.broadcast %cst_17 : f32 to vector<64x1xf32>
    %33 = arith.select %27, %22, %32 : vector<64x1xi1>, vector<64x1xf32>
    %cst_18 = arith.constant dense<0.000000e+00> : vector<1xf32>
    %34 = vector.multi_reduction <add>, %33, %cst_18 [0] : vector<64x1xf32> to vector<1xf32>
    %35 = vector.shape_cast %34 : vector<1xf32> to vector<1x1xf32>
    %36 = arith.index_cast %arg0 : i32 to index
    %37 = memref.load %arg1[%36] : memref<5xi32, #tpu.memory_space<smem>>
    %38 = arith.index_cast %37 : i32 to index
    %c0_19 = arith.constant 0 : index
    %39 = vector.load %arg8[%38, %c0_19] : memref<3x1xf32, #tpu.memory_space<vmem>>, vector<1x1xf32>
    %40 = arith.addf %39, %31 : vector<1x1xf32>
    %41 = arith.index_cast %37 : i32 to index
    %c0_20 = arith.constant 0 : index
    %42 = vector.load %arg8[%41, %c0_20] : memref<3x1xf32, #tpu.memory_space<vmem>>, vector<1x1xf32>
    tpu.vector_store %arg8[%41, %c0_20], %40 {strides = array<i32>} : memref<3x1xf32, #tpu.memory_space<vmem>>, vector<1x1xf32>,
    %43 = arith.index_cast %37 : i32 to index
    %c0_21 = arith.constant 0 : index
    %44 = vector.load %arg9[%43, %c0_21] : memref<3x1xf32, #tpu.memory_space<vmem>>, vector<1x1xf32>
    %45 = arith.addf %44, %35 : vector<1x1xf32>
    %46 = arith.index_cast %37 : i32 to index
    %c0_22 = arith.constant 0 : index
    %47 = vector.load %arg9[%46, %c0_22] : memref<3x1xf32, #tpu.memory_space<vmem>>, vector<1x1xf32>
    tpu.vector_store %arg9[%46, %c0_22], %45 {strides = array<i32>} : memref<3x1xf32, #tpu.memory_space<vmem>>, vector<1x1xf32>,
    return
  }
  func.func @transform_0(%arg0: i32, %arg1: memref<5xi32, #tpu.memory_space<smem>>, %arg2: memref<5xi32, #tpu.memory_space<smem>>) -> (i32, i32) {
    %c0_i32 = arith.constant 0 : i32
    %c0_i32_0 = arith.constant 0 : i32
    return %arg0, %c0_i32 : i32, i32
  }
  func.func @transform_1(%arg0: i32, %arg1: memref<5xi32, #tpu.memory_space<smem>>, %arg2: memref<5xi32, #tpu.memory_space<smem>>) -> (i32, i32) {
    %c0_i32 = arith.constant 0 : i32
    %c0_i32_0 = arith.constant 0 : i32
    %c0_i32_1 = arith.constant 0 : i32
    return %c0_i32, %c0_i32_0 : i32, i32
  }
  func.func @transform_2(%arg0: i32, %arg1: memref<5xi32, #tpu.memory_space<smem>>, %arg2: memref<5xi32, #tpu.memory_space<smem>>) -> (i32, i32) {
    %c0_i32 = arith.constant 0 : i32
    %c0_i32_0 = arith.constant 0 : i32
    %c0_i32_1 = arith.constant 0 : i32
    return %c0_i32, %c0_i32_0 : i32, i32
  }
  func.func @transform_3(%arg0: i32, %arg1: memref<5xi32, #tpu.memory_space<smem>>, %arg2: memref<5xi32, #tpu.memory_space<smem>>) -> (i32, i32) {
    %c0_i32 = arith.constant 0 : i32
    %c0_i32_0 = arith.constant 0 : i32
    %c0_i32_1 = arith.constant 0 : i32
    return %c0_i32, %c0_i32_0 : i32, i32
  }
  func.func @transform_4(%arg0: i32, %arg1: memref<5xi32, #tpu.memory_space<smem>>, %arg2: memref<5xi32, #tpu.memory_space<smem>>) -> (i32, i32) {
    %c0_i32 = arith.constant 0 : i32
    %c0_i32_0 = arith.constant 0 : i32
    %c0_i32_1 = arith.constant 0 : i32
    return %c0_i32, %c0_i32_0 : i32, i32
  }
  func.func @transform_5(%arg0: i32, %arg1: memref<5xi32, #tpu.memory_space<smem>>, %arg2: memref<5xi32, #tpu.memory_space<smem>>) -> (i32, i32) {
    %c0_i32 = arith.constant 0 : i32
    %c0_i32_0 = arith.constant 0 : i32
    %c0_i32_1 = arith.constant 0 : i32
    return %c0_i32, %c0_i32_0 : i32, i32
  }
  func.func @transform_6(%arg0: i32, %arg1: memref<5xi32, #tpu.memory_space<smem>>, %arg2: memref<5xi32, #tpu.memory_space<smem>>) -> (i32, i32) {
    %c0_i32 = arith.constant 0 : i32
    %c0_i32_0 = arith.constant 0 : i32
    %c0_i32_1 = arith.constant 0 : i32
    return %c0_i32, %c0_i32_0 : i32, i32
  }
}

</mosaic_0001>

<bundles_post_ra>
// kernel: tpu_custom_call.1
= control target key start
LH: loop header
LB: loop body
LE: loop exit
PB: predicated region body
PF: predicated region fallthrough
CT: control target
= control target key end

     0   :  { %s1512_s0 = inlined_call_operand.vmem [shape: s32[5], index: 0, kind: input, shape index: {}]   ;;  %s1513_s2 = inlined_call_operand.hbm [shape: f32[320,128], index: 2, kind: input, shape index: {}]   ;;  %s1514_s3 = inlined_call_operand.vmem [shape: f32[128,128], index: 3, kind: input, shape index: {}]   ;;  %s1515_s4 = inlined_call_operand.vmem [shape: f32[1,128], index: 4, kind: input, shape index: {}]   ;;  %s1516_s5 = inlined_call_operand.vmem [shape: f32[128,1], index: 5, kind: input, shape index: {}]   ;;  %s1517_s7 = inlined_call_operand.vmem [shape: f32[3,1], index: 7, kind: output, shape index: {0}]   ;;  %s1518_s8 = inlined_call_operand.vmem [shape: f32[3,1], index: 8, kind: output, shape index: {1}]   ;;  %s1519_s1 = inlined_call_operand.vmem [shape: s32[5], index: 1, kind: input, shape index: {}]   ;;  %s1520_s6 = inlined_call_operand.<no memory space> [shape: f32[1,1], index: 6, kind: input, shape index: {}]  }
   0x1   :  { %s14_s29 = sshll.u32 %s1512_s0, 4  ;;  %s18_s10 = sshll.u32 %s1519_s1, 4  ;;  %v22_v0 = vstv %s1520_s6  ;;  %s15_s29 = int_to_ptr.vmem [resolvable:$true] %s14_s29  ;;  %s19_s10 = int_to_ptr.vmem [resolvable:$true] %s18_s10 }
   0x2   :  { %23 = vst [vmem:[#allocation5] sm:$0x1] %v22_v0  ;;  %s1022_s13 = scalar_lea.vmem %s15_s29, 16  ;;  %p1027_p1 = scmp.lt.s32.totalorder %s15_s29, %s15_s29 }
   0x3   :  { %p1023_p0 = scmp.ne.s32.totalorder %s15_s29, %s1022_s13  ;;  %p1028_p2 = scmp.lt.s32.totalorder %s1022_s13, %s1022_s13 }
   0x5   :  { %p1029_p3 = por %p1028_p2, %p1027_p1 }
   0x7   :  { %p1030_p4 = pnand %p1029_p3, %p1023_p0 }
   0x9   :  { %1033 = shalt.err (!%p1030_p4)  }
   0xa   :  { %s1114_s14 = smov [#allocation3]   ;;  %s1034_s0 = scalar_lea.vmem %s19_s10, 16 }
   0xb   :  { %17 = dma.vmem_to_smem %s15_s29, 16, %s1114_s14, [#allocation2] }
   0xc   :  { %p1035_p5 = scmp.ne.s32.totalorder %s19_s10, %s1034_s0  ;;  %p1039_p6 = scmp.lt.s32.totalorder %s19_s10, %s19_s10 }
   0xd   :  { %p1040_p7 = scmp.lt.s32.totalorder %s1034_s0, %s1034_s0 }
   0xf   :  { %p1041_p8 = por %p1040_p7, %p1039_p6 }
  0x11   :  { %p1042_p9 = pnand %p1041_p8, %p1035_p5 }
  0x13   :  { %1045 = shalt.err (!%p1042_p9)  }
  0x14   :  { %s1115_s1 = smov [#allocation4]  }
  0x15   :  { %21 = dma.vmem_to_smem %s19_s10, 16, %s1115_s1, [#allocation2] }
  0x16   :  { %1092 = dma.done.wait [#allocation2], 32 }
  0x17   :  { %1093 = vsyncadd [#allocation2], 4294967264 }
  0x18   :  { %25 = sfence }
  0x19   :  { %26 = vsyncpa [#allocation7], 0 }
  0x1a   :  { %28 = vsyncpa [#allocation7 + $0x1], 0  ;;  %s1174_s6 = smov 0   ;;  %s1176_s15 = smov 0  }
  0x1b   :  { %s1178_s16 = smov 0   ;;  %s1180_s17 = smov 0  }
  0x1c LB: > { %s1193_s18 = sadd.s32 4294967295, %s1112_s17   ;;  %s1196_s19 = sadd.s32 1, %s1112_s17   ;;  %s1112_s17 = sphi %s1180_s17, %s1527_s17   ;;  %s1108_s16 = sphi %s1178_s16, %s1526_s16   ;;  %s1104_s15 = sphi %s1176_s15, %s1525_s15   ;;  %s1100_s6 = sphi %s1174_s6, %s1524_s6  }
  0x1d   : > { %s38_s20 = ssub.s32 %s1112_s17, %s1196_s19  ;;  %s41_s21 = sadd.s32 1, %s1108_s16 }
  0x1e   : > { %p39_p10 = scmp.eq.s32.totalorder %s38_s20, 0  ;;  %p48_p11 = scmp.ne.s32.totalorder %s1108_s16, %s1104_s15 }
  0x1f   : > { %p49_p12 = scmp.eq.s32.totalorder %s1112_s17, 0  ;;  %p54_p13 = scmp.ne.s32.totalorder %s1104_s15, %s1100_s6 }
  0x20   : > { %s1206_s22 = scalar_select %p39_p10, %s1108_s16, %s41_s21  }
  0x21   : > { %p50_p0 = por %p49_p12, %p48_p11  ;;  %p55_p1 = scmp.eq.s32.totalorder %s1193_s18, 0 }
  0x22   : > { %p952_p2 = scmp.lt.s32.totalorder %s1112_s17, 5  ;;  %s216_s24 = sand.u32 1, %s1108_s16  }
  0x23   : > { %p1210_p3 = por %p55_p1, %p54_p13  ;;  %s735_s25 = sshll.u32 %s216_s24, 6 }
  0x24   : > { %s745_s26 = sshll.u32 %s1112_s17, 10  ;;  %s220_s30 = scalar_lea.vmem [#allocation6], %s735_s25 }
  0x25   : > { %s1219_s29 = scalar_lea.hbm %s1513_s2, %s745_s26  ;;  %s227_s9 = sshll.u32 %s220_s30, 4  ;;  %s1221_s9 = int_to_ptr.vmem [resolvable:$true] %s227_s9 }
  0x26   : > { %p1223_p4 = pnand %p952_p2, %p50_p0  ;;  %s1228_s11 = scalar_lea.sflag [#allocation7], %s216_s24 }
  0x27   : > { %s1046_s12 = scalar_lea.hbm %s1219_s29, 1024  ;;  %s1051_s0 = scalar_lea.hbm %s1513_s2, 5120 }
  0x28   : > { %p1047_p6 = scmp.ne.s32.totalorder %s1219_s29, %s1046_s12  ;;  %p1048_p7 = pneg %p1223_p4 }
  0x29   : > { %p1052_p10 = scmp.lt.u32.totalorder %s1219_s29, %s1513_s2  ;;  %p1053_p11 = scmp.lt.u32.totalorder %s1051_s0, %s1046_s12 }
  0x2a   : > { %p1049_p8 = pnand %p1048_p7, %p1047_p6  ;;  %p1055_p13 = scmp.lt.u32.totalorder %s1046_s12, %s1219_s29 }
  0x2b   : > { %p1054_p12 = por %p1053_p11, %p1052_p10 }
  0x2c   : > { %p1050_p9 = pneg %p1049_p8 }
  0x2d   : > { %p1056_p0 = por %p1055_p13, %p1054_p12 }
  0x2f   : > { %p1057_p1 = pnand %p1056_p0, %p1050_p9 }
  0x31   : > { %1060 = shalt.err (!%p1057_p1)
}
  0x32   : > { %s1061_s20 = scalar_lea.vmem %s1221_s9, 1024  ;;  %s1116_s21 = smov [#allocation6]  }
  0x33   : > { %p1062_p2 = scmp.ne.s32.totalorder %s1221_s9, %s1061_s20  ;;  %s1066_s24 = sshll.u32 %s1116_s21, 4  ;;  %s1067_s24 = int_to_ptr.vmem [resolvable:$false] %s1066_s24 }
  0x34   : > { %s1068_s25 = scalar_lea.vmem %s1067_s24, 2048  ;;  %p1069_p5 = scmp.lt.s32.totalorder %s1221_s9, %s1067_s24 }
  0x35   : > { %p1064_p6 = pnand %p1062_p2, %p1048_p7  ;;  %p1070_p10 = scmp.lt.s32.totalorder %s1068_s25, %s1061_s20 }
  0x37   : > { %p1065_p8 = pneg %p1064_p6  ;;  %p1071_p11 = por %p1070_p10, %p1069_p5 }
  0x39   : > { %p1072_p12 = pnand %p1071_p11, %p1065_p8 }
  0x3b   : > { %1075 = shalt.err (!%p1072_p12)
}
  0x3c   : > { %s1117_s26 = smov 128   ;;  %s1118_s27 = smov 8  }
  0x3d   : > { %951 = dma.hbm_to_vmem [thread:$0]  (!%p1223_p4), %s1219_s29, 1024, %s1221_s9, %s1228_s11, %s1117_s26, %s1117_s26, %s1118_s27  }
  0x3e   : > { %p235_p7 = scmp.lt.s32.totalorder %s1112_s17, 6  ;;  %p1523_p9 = scmp.ge.s32.totalorder %s1112_s17, 1 }
  0x40   : > { %p236_p13 = pnand %p1523_p9, %p235_p7 }
  0x41   : > { %s241_s28 = sand.u32 (!%p236_p13), 1, %s1104_s15  }
  0x42   : > { %239 = sbr.rel (%p236_p13) target bundleno = 614 (0x266), region = 40  ;;  %s739_s30 = sshll.u32 (!%p236_p13), %s241_s28, 6 }
  0x43   : > { %s242_s12 = scalar_lea.sflag (!%p236_p13), [#allocation7], %s241_s28  ;;  %s1260_s13 = scalar_lea.vmem (!%p236_p13), [#allocation6], %s739_s30 }
  0x49   : > { %1095 = dma.done.wait (%p1210_p3), %s242_s12, 1024  }
  0x4a   : > { %1097 = vsyncadd (%p1210_p3), %s242_s12, 4294966272  ;;  %p740_p5 = scmp.ne.s32.totalorder %s1193_s18, 0 }
  0x4b   : > { %vm274_vm0 = vcmask (!%p740_p5), 2048   ;;  %v1119_v1 = vmov (!%p740_p5), 0.0  }
  0x4c   : > { %273 = sbr.rel (%p740_p5) target bundleno = 83 (0x53), region = 48  ;;  %275 = vst.msk [vmem:[%s1517_s7] sm:$0x7] (!%p740_p5), %vm274_vm0, %v1119_v1  ;;  %276 = vst.msk [vmem:[%s1518_s8] sm:$0x7] (!%p740_p5), %vm274_vm0, %v1119_v1 }
  0x53 PF: > { %v285_v2 = vld [vmem:[%s1514_s3] sm:$0xff]  ;;  %v286_v3 = vld [vmem:[%s1514_s3 + $0x8] sm:$0xff]  ;;  %v287_v4 = vld [vmem:[%s1514_s3 + $0x10] sm:$0xff]  ;;  %vm624_vm2 = vcmask 7168   ;;  %s1455_s25 = sld [smem:[#allocation3 + %s1193_s18]]  ;;  %vm679_vm10 = vcmask 0  }
  0x54   : > { %v882_v5 = vpack.c.bf16 %v286_v3, %v285_v2  ;;  %v288_v6 = vld [vmem:[%s1514_s3 + $0x18] sm:$0xff]  ;;  %v289_v8 = vld [vmem:[%s1514_s3 + $0x20] sm:$0xff]  ;;  %v290_v9 = vld [vmem:[%s1514_s3 + $0x28] sm:$0xff] }
  0x55   : > { %v886_v7 = vpack.c.bf16 %v288_v6, %v287_v4  ;;  %v890_v10 = vpack.c.bf16 %v290_v9, %v289_v8  ;;  %v277_v11 = vld [vmem:[%s1260_s13] sm:$0xff]  ;;  %v291_v12 = vld [vmem:[%s1514_s3 + $0x30] sm:$0xff]  ;;  %v292_v13 = vld [vmem:[%s1514_s3 + $0x38] sm:$0xff] }
  0x56   : > { %883 = vmatprep.subr.bf16.mxu0 %v882_v5  ;;  %826 = vmatprep.mubr.f32.mxu0 %v277_v11  ;;  %v421_v14 = vld [vmem:[%s1516_s5] sm:$0xff]  ;;  %v422_v15 = vld [vmem:[%s1516_s5 + $0x8] sm:$0xff]  ;;  %v423_v16 = vld [vmem:[%s1516_s5 + $0x10] sm:$0xff]  ;;  %v894_v17 = vpack.c.bf16 %v292_v13, %v291_v12 }
  0x57   : > { %885 = vmatpush3.bf16.msra.mxu0 %v882_v5  ;;  %v293_v18 = vld [vmem:[%s1514_s3 + $0x40] sm:$0xff]  ;;  %v914_v19 = vpack.c.bf16 %v422_v15, %v421_v14  ;;  %v424_v20 = vld [vmem:[%s1516_s5 + $0x18] sm:$0xff]  ;;  %v294_v21 = vld [vmem:[%s1514_s3 + $0x48] sm:$0xff] }
  0x58   : > { %887 = vmatprep.subr.bf16.mxu0 %v886_v7  ;;  %v918_v22 = vpack.c.bf16 %v424_v20, %v423_v16  ;;  %v425_v23 = vld [vmem:[%s1516_s5 + $0x20] sm:$0xff]  ;;  %v426_v24 = vld [vmem:[%s1516_s5 + $0x28] sm:$0xff]  ;;  %v898_v25 = vpack.c.bf16 %v294_v21, %v293_v18  ;;  %v295_v26 = vld [vmem:[%s1514_s3 + $0x50] sm:$0xff] }
  0x59   : > { %915 = vmatprep.subr.bf16.mxu1 %v914_v19  ;;  %v922_v27 = vpack.c.bf16 %v426_v24, %v425_v23  ;;  %v296_v28 = vld [vmem:[%s1514_s3 + $0x58] sm:$0xff]  ;;  %v427_v29 = vld [vmem:[%s1516_s5 + $0x30] sm:$0xff]  ;;  %v297_v32 = vld [vmem:[%s1514_s3 + $0x60] sm:$0xff]  ;;  %s676_s27 = scalar_lea.vmem %s1517_s7, %s1455_s25  ;;  %s681_s12 = scalar_lea.vmem %s1518_s8, %s1455_s25 }
  0x5a   : > { %917 = vmatpush3.bf16.msra.mxu1 %v914_v19  ;;  %v428_v30 = vld [vmem:[%s1516_s5 + $0x38] sm:$0xff]  ;;  %v902_v31 = vpack.c.bf16 %v296_v28, %v295_v26  ;;  %v298_v34 = vld [vmem:[%s1514_s3 + $0x68] sm:$0xff]  ;;  %v429_v35 = vld [vmem:[%s1516_s5 + $0x40] sm:$0xff]  ;;  %v598_v19 = vlaneseq }
  0x5b   : > { %889 = vmatpush3.bf16.msra.mxu0 %v886_v7  ;;  %919 = vmatprep.subr.bf16.mxu1 %v918_v22  ;;  %v926_v33 = vpack.c.bf16 %v428_v30, %v427_v29  ;;  %v430_v36 = vld [vmem:[%s1516_s5 + $0x48] sm:$0xff]  ;;  %v906_v37 = vpack.c.bf16 %v298_v34, %v297_v32  ;;  %v299_v38 = vld [vmem:[%s1514_s3 + $0x70] sm:$0xff]  ;;  %v300_v40 = vld [vmem:[%s1514_s3 + $0x78] sm:$0xff] }
  0x5c   : > { %891 = vmatprep.subr.bf16.mxu0 %v890_v10  ;;  %v930_v39 = vpack.c.bf16 %v430_v36, %v429_v35  ;;  %v431_v41 = vld [vmem:[%s1516_s5 + $0x50] sm:$0xff]  ;;  %v432_v42 = vld [vmem:[%s1516_s5 + $0x58] sm:$0xff]  ;;  %v910_v43 = vpack.c.bf16 %v300_v40, %v299_v38  ;;  %v433_v45 = vld [vmem:[%s1516_s5 + $0x60] sm:$0xff]  ;;  %v1381_v20 = vshrl.u32 %v598_v19, 7 }
  0x5d   : > { %v934_v44 = vpack.c.bf16 %v432_v42, %v431_v41  ;;  %v434_v46 = vld [vmem:[%s1516_s5 + $0x68] sm:$0xff]  ;;  %v279_v49 = vld [vmem:[%s1260_s13 + $0x10] sm:$0xff]  ;;  %v280_v50 = vld [vmem:[%s1260_s13 + $0x18] sm:$0xff] }
  0x5e   : > { %921 = vmatpush3.bf16.msra.mxu1 %v918_v22  ;;  %v938_v47 = vpack.c.bf16 %v434_v46, %v433_v45  ;;  %v278_v48 = vld [vmem:[%s1260_s13 + $0x8] sm:$0xff]  ;;  %v281_v51 = vld [vmem:[%s1260_s13 + $0x20] sm:$0xff]  ;;  %v283_v53 = vld [vmem:[%s1260_s13 + $0x30] sm:$0xff]  ;;  %v1384_v21 = vadd.s32 8, %v1381_v20  ;;  %v1389_v24 = vadd.s32 24, %v1381_v20  ;;  %v1394_v26 = vadd.s32 16, %v1381_v20 }
  0x5f   : > { %893 = vmatpush3.bf16.msra.mxu0 %v890_v10  ;;  %923 = vmatprep.subr.bf16.mxu1 %v922_v27  ;;  %v282_v52 = vld [vmem:[%s1260_s13 + $0x28] sm:$0xff]  ;;  %v284_v54 = vld [vmem:[%s1260_s13 + $0x38] sm:$0xff]  ;;  %s597_s13 = sld [smem:[#allocation4 + %s1193_s18]]  ;;  %v1404_v32 = vadd.s32 40, %v1381_v20  ;;  %v1414_v41 = vadd.s32 32, %v1381_v20  ;;  %v1419_v46 = vadd.s32 48, %v1381_v20 }
  0x60   : > { %895 = vmatprep.subr.bf16.mxu0 %v894_v17  ;;  %v435_v55 = vld [vmem:[%s1516_s5 + $0x70] sm:$0xff]  ;;  %v436_v56 = vld [vmem:[%s1516_s5 + $0x78] sm:$0xff]  ;;  %v741_v58 = vld [vmem:[%s1515_s4] ss:$0 sm:$0xff] }
  0x61   : > { %v942_v57 = vpack.c.bf16 %v436_v56, %v435_v55  ;;  %v742_v23 = vld [vmem:[#allocation5] ss:$0 sm:$0xff] }
  0x62   : > { %925 = vmatpush3.bf16.msra.mxu1 %v922_v27 }
  0x63   : > { %897 = vmatpush3.bf16.msra.mxu0 %v894_v17  ;;  %927 = vmatprep.subr.bf16.mxu1 %v926_v33 }
  0x64   : > { %899 = vmatprep.subr.bf16.mxu0 %v898_v25 }
  0x65   : > { %v1386_v22 = vstv %s597_s13 }
  0x66   : > { %929 = vmatpush3.bf16.msra.mxu1 %v926_v33  ;;  %vm609_vm1 = vcmp.lt.s32.totalorder %v1384_v21, %v1386_v22  ;;  %vm608_vm3 = vcmp.lt.s32.totalorder %v1381_v20, %v1386_v22  ;;  %vm611_vm4 = vcmp.lt.s32.totalorder %v1389_v24, %v1386_v22  ;;  %vm610_vm5 = vcmp.lt.s32.totalorder %v1394_v26, %v1386_v22 }
  0x67   : > { %901 = vmatpush3.bf16.msra.mxu0 %v898_v25  ;;  %931 = vmatprep.subr.bf16.mxu1 %v930_v39  ;;  %vm613_vm6 = vcmp.lt.s32.totalorder %v1404_v32, %v1386_v22  ;;  %vm612_vm7 = vcmp.lt.s32.totalorder %v1414_v41, %v1386_v22  ;;  %vm614_vm8 = vcmp.lt.s32.totalorder %v1419_v46, %v1386_v22 }
  0x68   : > { %903 = vmatprep.subr.bf16.mxu0 %v902_v31 }
  0x6a   : > { %933 = vmatpush3.bf16.msra.mxu1 %v930_v39 }
  0x6b   : > { %905 = vmatpush3.bf16.msra.mxu0 %v902_v31  ;;  %935 = vmatprep.subr.bf16.mxu1 %v934_v44 }
  0x6c   : > { %907 = vmatprep.subr.bf16.mxu0 %v906_v37 }
  0x6e   : > { %937 = vmatpush3.bf16.msra.mxu1 %v934_v44 }
  0x6f   : > { %909 = vmatpush3.bf16.msra.mxu0 %v906_v37  ;;  %939 = vmatprep.subr.bf16.mxu1 %v938_v47 }
  0x70   : > { %911 = vmatprep.subr.bf16.mxu0 %v910_v43 }
  0x72   : > { %941 = vmatpush3.bf16.msra.mxu1 %v938_v47 }
  0x73   : > { %913 = vmatpush3.bf16.msra.mxu0 %v910_v43  ;;  %943 = vmatprep.subr.bf16.mxu1 %v942_v57 }
  0x76   : > { %827 = vmatmul.mubr.f32.vlgmr.msra.gmra.mrb[0].mxu0 %v278_v48  ;;  %945 = vmatpush3.bf16.msra.mxu1 %v942_v57 }
  0x77   : > { %829 = vmatprep.mubr.f32.mxu0 %v279_v49 }
  0x7a   : > { %830 = vmatmul.mubr.f32.gmra.mrb[2].mxu0 %v280_v50 }
  0x7b   : > { %832 = vmatprep.mubr.f32.mxu0 %v281_v51 }
  0x7e   : > { %833 = vmatmul.mubr.f32.gmra.mrb[4].mxu0 %v282_v52 }
  0x7f   : > { %835 = vmatprep.mubr.f32.mxu0 %v283_v53 }
  0x82   : > { %836 = vmatmul.mubr.f32.gmra.mrb[6].mxu0 %v284_v54 }
 0x149   : > { %v828_v59 = vpop.f32.mrb[0].mxu0 }
 0x14a   : > { %v380_v60 = vadd.f32 %v828_v59, %v741_v58  ;;  %v374_v61 = vpop.f32.mrb[1].mxu0 }
 0x14b   : > { %v375_v62 = vadd.f32 %v741_v58, %v374_v61 }
 0x14c   : > { %v414_v1 = vmax.f32 %v380_v60, 0.0 }
 0x14d   : > { %v831_v63 = vpop.f32.mrb[2].mxu0  ;;  %v413_v0 = vmax.f32 %v375_v62, 0.0 }
 0x14e   : > { %v390_v2 = vadd.f32 %v831_v63, %v741_v58  ;;  %v384_v3 = vpop.f32.mrb[3].mxu0 }
 0x14f   : > { %v385_v4 = vadd.f32 %v741_v58, %v384_v3  ;;  %870 = vmatprep.mubr.f32.mxu1 %v413_v0 }
 0x150   : > { %871 = vmatmul.mubr.f32.vlgmr.msra.gmra.mrb[0].mxu1 %v414_v1  ;;  %v416_v7 = vmax.f32 %v390_v2, 0.0 }
 0x151   : > { %v415_v5 = vmax.f32 %v385_v4, 0.0  ;;  %v834_v6 = vpop.f32.mrb[4].mxu0 }
 0x152   : > { %v400_v8 = vadd.f32 %v834_v6, %v741_v58  ;;  %v394_v9 = vpop.f32.mrb[5].mxu0 }
 0x153   : > { %v395_v10 = vadd.f32 %v741_v58, %v394_v9  ;;  %873 = vmatprep.mubr.f32.mxu1 %v415_v5 }
 0x154   : > { %874 = vmatmul.mubr.f32.gmra.mrb[2].mxu1 %v416_v7  ;;  %v418_v13 = vmax.f32 %v400_v8, 0.0 }
 0x155   : > { %v417_v11 = vmax.f32 %v395_v10, 0.0  ;;  %v837_v12 = vpop.f32.mrb[6].mxu0 }
 0x156   : > { %v410_v14 = vadd.f32 %v837_v12, %v741_v58  ;;  %v404_v15 = vpop.f32.mrb[7].mxu0 }
 0x157   : > { %v405_v16 = vadd.f32 %v741_v58, %v404_v15  ;;  %876 = vmatprep.mubr.f32.mxu1 %v417_v11  ;;  %v1431_v58 = vadd.s32 56, %v1381_v20 }
 0x158   : > { %877 = vmatmul.mubr.f32.gmra.mrb[4].mxu1 %v418_v13  ;;  %v420_v18 = vmax.f32 %v410_v14, 0.0 }
 0x159   : > { %v419_v17 = vmax.f32 %v405_v16, 0.0  ;;  %vm615_vm9 = vcmp.lt.s32.totalorder %v1431_v58, %v1386_v22 }
 0x15b   : > { %879 = vmatprep.mubr.f32.mxu1 %v419_v17 }
 0x15c   : > { %880 = vmatmul.mubr.f32.gmra.mrb[6].mxu1 %v420_v18 }
 0x223   : > { %v872_v25 = vpop.f32.mrb[0].mxu1 }
 0x224   : > { %v516_v27 = vadd.f32 %v872_v25, %v742_v23  ;;  %v510_v28 = vpop.f32.mrb[1].mxu1 }
 0x225   : > { %v511_v29 = vadd.f32 %v742_v23, %v510_v28 }
 0x226   : > { %v550_v30 = vsub.f32 0.0, %v516_v27  ;;  %v617_v31 = vsel %vm609_vm1, %v516_v27, 0.0 }
 0x227   : > { %v626_v33 = vsel %vm624_vm2, %v617_v31, 0.0  ;;  %v549_v34 = vsub.f32 0.0, %v511_v29  ;;  %v616_v35 = vsel %vm608_vm3, %v511_v29, 0.0  ;;  %v875_v36 = vpop.f32.mrb[2].mxu1 }
 0x228   : > { %v559_v37 = vmul.f32 1.442695, %v550_v30  ;;  %v625_v38 = vsel %vm624_vm2, %v616_v35, 0.0  ;;  %v526_v39 = vadd.f32 %v875_v36, %v742_v23  ;;  %v520_v40 = vpop.f32.mrb[3].mxu1 }
 0x229   : > { %v557_v42 = vmul.f32 1.442695, %v549_v34  ;;  %v627_v43 = vadd.f32 %v626_v33, %v625_v38  ;;  %v521_v44 = vadd.f32 %v742_v23, %v520_v40 }
 0x22a   : > { %990 = vpow2.f32 %v559_v37  ;;  %v552_v45 = vsub.f32 0.0, %v526_v39  ;;  %v619_v47 = vsel %vm611_vm4, %v526_v39, 0.0 }
 0x22b   : > { %992 = vpow2.f32 %v557_v42  ;;  %v551_v48 = vsub.f32 0.0, %v521_v44  ;;  %v618_v49 = vsel %vm610_vm5, %v521_v44, 0.0  ;;  %v878_v50 = vpop.f32.mrb[4].mxu1  ;;  %v630_v59 = vsel %vm624_vm2, %v619_v47, 0.0 }
 0x22c   : > { %v563_v51 = vmul.f32 1.442695, %v552_v45  ;;  %v628_v52 = vsel %vm624_vm2, %v618_v49, 0.0  ;;  %v536_v53 = vadd.f32 %v878_v50, %v742_v23  ;;  %v530_v54 = vpop.f32.mrb[5].mxu1 }
 0x22d   : > { %v561_v55 = vmul.f32 1.442695, %v551_v48  ;;  %v629_v56 = vadd.f32 %v628_v52, %v627_v43  ;;  %v531_v57 = vadd.f32 %v742_v23, %v530_v54  ;;  %v677_v54 = vld [vmem:[%s676_s27] sm:$0x1] }
 0x22e   : > { %994 = vpow2.f32 %v563_v51  ;;  %v554_v60 = vsub.f32 0.0, %v536_v53  ;;  %v621_v61 = vsel %vm613_vm6, %v536_v53, 0.0 }
 0x22f   : > { %996 = vpow2.f32 %v561_v55  ;;  %v553_v62 = vsub.f32 0.0, %v531_v57  ;;  %v620_v63 = vsel %vm612_vm7, %v531_v57, 0.0  ;;  %v881_v0 = vpop.f32.mrb[6].mxu1  ;;  %v631_v2 = vadd.f32 %v630_v59, %v629_v56 }
 0x230   : > { %v567_v1 = vmul.f32 1.442695, %v554_v60  ;;  %v632_v3 = vsel %vm624_vm2, %v620_v63, 0.0  ;;  %v546_v4 = vadd.f32 %v881_v0, %v742_v23  ;;  %v540_v5 = vpop.f32.mrb[7].mxu1  ;;  %v634_v10 = vsel %vm624_vm2, %v621_v61, 0.0 }
 0x231   : > { %v565_v6 = vmul.f32 1.442695, %v553_v62  ;;  %v541_v7 = vadd.f32 %v742_v23, %v540_v5  ;;  %v633_v8 = vadd.f32 %v632_v3, %v631_v2 }
 0x232   : > { %998 = vpow2.f32 %v567_v1  ;;  %v556_v9 = vsub.f32 0.0, %v546_v4  ;;  %v623_v15 = vsel %vm615_vm9, %v546_v4, 0.0 }
 0x233   : > { %1000 = vpow2.f32 %v565_v6  ;;  %v555_v11 = vsub.f32 0.0, %v541_v7  ;;  %v622_v12 = vsel %vm614_vm8, %v541_v7, 0.0  ;;  %v635_v16 = vadd.f32 %v634_v10, %v633_v8 }
 0x234   : > { %v991_v13 = vpop.eup %990  ;;  %v571_v14 = vmul.f32 1.442695, %v556_v9  ;;  %v636_v17 = vsel %vm624_vm2, %v622_v12, 0.0  ;;  %v638_v28 = vsel %vm624_vm2, %v623_v15, 0.0 }
 0x235   : > { %v993_v18 = vpop.eup %992  ;;  %v574_v19 = vadd.f32 1.0, %v991_v13  ;;  %v569_v23 = vmul.f32 1.442695, %v555_v11  ;;  %v637_v27 = vadd.f32 %v636_v17, %v635_v16 }
 0x236   : > { %v573_v25 = vadd.f32 1.0, %v993_v18  ;;  %1002 = vpow2.f32 %v571_v14 }
 0x237   : > { %1004 = vrcp.f32 %v574_v19  ;;  %v639_v30 = vadd.f32 %v638_v28, %v637_v27  ;;  %v682_v19 = vld [vmem:[%s681_s12] sm:$0x1] }
 0x238   : > { %v995_v29 = vpop.eup %994  ;;  %1006 = vrcp.f32 %v573_v25 }
 0x239   : > { %v997_v31 = vpop.eup %996  ;;  %v576_v33 = vadd.f32 1.0, %v995_v29  ;;  %1008 = vpow2.f32 %v569_v23  ;;  %v640_v35 = vrot.slane %v639_v30, 4 }
 0x23a   : > { %v575_v34 = vadd.f32 1.0, %v997_v31 }
 0x23b   : > { %1010 = vrcp.f32 %v576_v33  ;;  %v641_v37 = vadd.f32 %v640_v35, %v639_v30 }
 0x23c   : > { %v999_v36 = vpop.eup %998  ;;  %1012 = vrcp.f32 %v575_v34 }
 0x23d   : > { %v1001_v38 = vpop.eup %1000  ;;  %v578_v39 = vadd.f32 1.0, %v999_v36  ;;  %v642_v42 = vrot.slane %v641_v37, 2 }
 0x23e   : > { %v577_v40 = vadd.f32 1.0, %v1001_v38 }
 0x23f   : > { %1014 = vrcp.f32 %v578_v39  ;;  %v643_v44 = vadd.f32 %v642_v42, %v641_v37 }
 0x240   : > { %v1003_v43 = vpop.eup %1002  ;;  %1016 = vrcp.f32 %v577_v40 }
 0x241   : > { %v1005_v45 = vpop.eup %1004  ;;  %v580_v47 = vadd.f32 1.0, %v1003_v43  ;;  %v644_v50 = vrot.slane %v643_v44, 1 }
 0x242   : > { %v1007_v48 = vpop.eup %1006  ;;  %v647_v49 = vsel %vm609_vm1, %v1005_v45, 0.0 }
 0x243   : > { %v1009_v51 = vpop.eup %1008  ;;  %v655_v52 = vsel %vm624_vm2, %v647_v49, 0.0  ;;  %v646_v53 = vsel %vm608_vm3, %v1007_v48, 0.0  ;;  %1018 = vrcp.f32 %v580_v47  ;;  %v645_v57 = vadd.f32 %v644_v50, %v643_v44 }
 0x244   : > { %v654_v55 = vsel %vm624_vm2, %v646_v53, 0.0  ;;  %v579_v56 = vadd.f32 1.0, %v1009_v51 }
 0x245   : > { %v1011_v59 = vpop.eup %1010  ;;  %v656_v60 = vadd.f32 %v655_v52, %v654_v55  ;;  %v678_v21 = vadd.f32 %v677_v54, %v645_v57 }
 0x246   : > { %v1013_v61 = vpop.eup %1012  ;;  %1020 = vrcp.f32 %v579_v56  ;;  %v649_v62 = vsel %vm611_vm4, %v1011_v59, 0.0 }
 0x247   : > { %v648_v20 = vsel %vm610_vm5, %v1013_v61, 0.0  ;;  %680 = vst.msk [vmem:[%s676_s27] sm:$0x1] %vm679_vm10, %v678_v21  ;;  %v659_v3 = vsel %vm624_vm2, %v649_v62, 0.0 }
 0x248   : > { %v657_v63 = vsel %vm624_vm2, %v648_v20, 0.0 }
 0x249   : > { %v1015_v0 = vpop.eup %1014  ;;  %v658_v1 = vadd.f32 %v657_v63, %v656_v60 }
 0x24a   : > { %v1017_v2 = vpop.eup %1016  ;;  %v651_v4 = vsel %vm613_vm6, %v1015_v0, 0.0 }
 0x24b   : > { %v650_v24 = vsel %vm612_vm7, %v1017_v2, 0.0  ;;  %v660_v5 = vadd.f32 %v659_v3, %v658_v1  ;;  %v663_v8 = vsel %vm624_vm2, %v651_v4, 0.0 }
 0x24c   : > { %v661_v26 = vsel %vm624_vm2, %v650_v24, 0.0 }
 0x24d   : > { %v662_v6 = vadd.f32 %v661_v26, %v660_v5  ;;  %v1019_v7 = vpop.eup %1018 }
 0x24e   : > { %v653_v11 = vsel %vm615_vm9, %v1019_v7, 0.0 }
 0x24f   : > { %v664_v9 = vadd.f32 %v663_v8, %v662_v6  ;;  %v667_v13 = vsel %vm624_vm2, %v653_v11, 0.0 }
 0x250   : > { %v1021_v10 = vpop.eup %1020 }
 0x251   : > { %v652_v32 = vsel %vm614_vm8, %v1021_v10, 0.0 }
 0x252   : > { %v665_v41 = vsel %vm624_vm2, %v652_v32, 0.0 }
 0x253   : > { %v666_v12 = vadd.f32 %v665_v41, %v664_v9 }
 0x255   : > { %v668_v14 = vadd.f32 %v667_v13, %v666_v12 }
 0x257   : > { %v669_v15 = vrot.slane %v668_v14, 4 }
 0x259   : > { %v670_v16 = vadd.f32 %v669_v15, %v668_v14 }
 0x25b   : > { %v671_v17 = vrot.slane %v670_v16, 2 }
 0x25d   : > { %v672_v18 = vadd.f32 %v671_v17, %v670_v16 }
 0x25f   : > { %v673_v58 = vrot.slane %v672_v18, 1 }
 0x261   : > { %v674_v23 = vadd.f32 %v673_v58, %v672_v18 }
 0x263   : > { %v683_v25 = vadd.f32 %v682_v19, %v674_v23 }
 0x265   : > { %684 = vst.msk [vmem:[%s681_s12] sm:$0x1] %vm679_vm10, %v683_v25 }
 0x266 PF: > { %p31_p3 = scmp.ge.s32.totalorder %s1196_s19, 7   ;;  %s1524_s6 = smov %s1104_s15 }
 0x267   : > { %s1525_s15 = smov %s1108_s16  ;;  %s1526_s16 = smov %s1206_s22 }
 0x268   : > { %s1527_s17 = smov %s1196_s19  ;;  %33 = sbr.rel (!%p31_p3) target bundleno = 28 (0x1c), region = 90 }
 0x26f   :  { %702 = vsyncpa [#allocation7], 1 }
 0x270   :  { %704 = vsyncpa [#allocation7 + $0x1], 1 }

</bundles_post_ra>
